<compile_context>
chip_gen: v5e
topology: v5e:2x2
jax: 0.10.0
libtpu: 0.0.40
codegen_flags: <defaults>
</compile_context>

<pallas_src>
import functools
import math

import jax
import jax.numpy as jnp
from jax.experimental import pallas as pl
from jax.experimental.pallas import tpu as pltpu


LANES = 128              # vreg lane width: last dim of every block
SINGLE_BLOCK_ROWS = 512  # below this, one full-extent block (pipelining not worth it)


def _tpu_vmem_capacity_bytes():
    try:
        return int(pltpu.get_tpu_info().vmem_capacity_bytes)
    except Exception:
        # Conservative fallback: v7x per-TensorCore VMEM (smallest generation).
        return 64 * 1024 * 1024


_VMEM_CAPACITY = _tpu_vmem_capacity_bytes()
# Scoped VMEM limit: ~0.75x physical, capped; leaves compiler-scratch headroom.
# v7x (64 MiB)  -> 48 MiB ;  v5e/v6e (128 MiB) -> 96 MiB.
VMEM_LIMIT_BYTES = min(int(0.75 * _VMEM_CAPACITY), 96 * 1024 * 1024)
# Whole-array (single block, no pipelining) fallback path: in + out + func
# intermediates must fit -> allow ~1/3 of the scoped limit.
# v7x -> 16 MiB ;  v5e/v6e -> 32 MiB.
_WHOLE_ARRAY_BYTE_LIMIT = min(VMEM_LIMIT_BYTES // 3, 32 * 1024 * 1024)


def _round_up(n, m):
    return ((n + m - 1) // m) * m


def _elementwise_kernel(func, out_dtype, x_ref, o_ref):
    # Hot path: user func applied to a lane-dense (tile_rows, 128) VMEM tile.
    o_ref[...] = func(x_ref[...]).astype(out_dtype)


def _make_cost_estimate(func, x2d, out_dtype):
    in_bytes = x2d.size * jnp.dtype(x2d.dtype).itemsize
    out_bytes = x2d.size * jnp.dtype(out_dtype).itemsize
    try:
        cost = pl.estimate_cost(func, jax.ShapeDtypeStruct(x2d.shape, x2d.dtype))
        if isinstance(cost, pl.CostEstimate):
            return cost
    except Exception:
        pass
    # Conservative manual estimate (advisory only): >=1 op/element, no claimed
    # transcendentals, bytes from the *unpadded* in/out slabs.
    return pl.CostEstimate(
        flops=int(x2d.size),
        transcendentals=0,
        bytes_accessed=int(in_bytes + out_bytes),
    )


def _elementwise_pallas_2d(func, x2d, out_dtype):
    """Run elementwise `func` over a lane-dense (rows, 128) slab via a tiled grid."""
    rows = x2d.shape[0]
    itemsize = max(jnp.dtype(x2d.dtype).itemsize, jnp.dtype(out_dtype).itemsize)

    if rows <= SINGLE_BLOCK_ROWS:
        tile_rows = rows  # single full-extent block (block == array dims)
    else:
        # Per-buffer byte budget: keep double-buffered in+out well under the
        # scoped limit (2*(in+out) <= ~limit/2).  4-8 MiB per buffer.
        buf_budget = max(4 * 1024 * 1024, min(8 * 1024 * 1024, VMEM_LIMIT_BYTES // 8))
        max_tile_rows = max(8, (buf_budget // (LANES * itemsize)) // 8 * 8)
        # Ensure >=2 grid steps so ("parallel",) can shard rows across
        # v7x's two TensorCores (no-op on single-TC v5e/v6e).
        half_rows = _round_up(pl.cdiv(rows, 2), 8)
        tile_rows = min(max_tile_rows, half_rows)

    # Partial last block is handled by Pallas (block_shape need not divide the
    # array; out-of-bounds output writes are dropped).
    grid = (pl.cdiv(rows, tile_rows),)

    kernel = functools.partial(_elementwise_kernel, func, out_dtype)
    cost = _make_cost_estimate(func, x2d, out_dtype)

    return pl.pallas_call(
        kernel,
        out_shape=jax.ShapeDtypeStruct((rows, LANES), out_dtype),
        grid=grid,
        in_specs=[pl.BlockSpec((tile_rows, LANES), lambda i: (i, 0))],
        out_specs=pl.BlockSpec((tile_rows, LANES), lambda i: (i, 0)),
        compiler_params=pltpu.CompilerParams(
            dimension_semantics=("parallel",),  # both TCs on v7x; no-op on v5e/v6e
            vmem_limit_bytes=VMEM_LIMIT_BYTES,
        ),
        cost_estimate=cost,
    )(x2d)


def _elementwise_pallas(func, x, out_dtype):
    """Elementwise fast path: lane-dense slab, tiled pipelined grid, no full-array pads."""
    orig_shape = x.shape
    total = int(x.size)
    if total == 0:
        return func(x)

    flat = x.reshape(-1)                    # layout glue, no data movement cost to speak of
    n_main = (total // LANES) * LANES
    if n_main == 0:
        # < one lane of data: not worth a kernel launch.
        return func(x)

    if n_main == total:
        # Aligned case (the common one): zero wrapper-side copies.
        x2d = flat.reshape(n_main // LANES, LANES)
        y2d = _elementwise_pallas_2d(func, x2d, out_dtype)
        return y2d.reshape(orig_shape)

    # Non-multiple-of-128 total: run the kernel on the aligned prefix and the
    # (<=127-element) tail in plain JAX -- avoids a full-array pad + slice
    # round trip through HBM.
    x2d = flat[:n_main].reshape(n_main // LANES, LANES)
    y_main = _elementwise_pallas_2d(func, x2d, out_dtype).reshape(-1)
    y_tail = func(flat[n_main:]).astype(out_dtype)
    return jnp.concatenate([y_main, y_tail]).reshape(orig_shape)


def _whole_array_pallas(func, x, out_sds):
    """Non-elementwise but shape-preserving funcs: one whole-array VMEM block."""

    def kernel(x_ref, o_ref):
        o_ref[...] = func(x_ref[...]).astype(o_ref.dtype)

    return pl.pallas_call(
        kernel,
        out_shape=jax.ShapeDtypeStruct(out_sds.shape, out_sds.dtype),
        in_specs=[pl.BlockSpec(memory_space=pltpu.MemorySpace.VMEM)],
        out_specs=pl.BlockSpec(memory_space=pltpu.MemorySpace.VMEM),
        compiler_params=pltpu.CompilerParams(vmem_limit_bytes=VMEM_LIMIT_BYTES),
    )(x)


class Lambda:
    """Generic forward pass: __call__(x) = func(x), with func run in a Pallas kernel.

    Set `elementwise=True` when `func` is purely elementwise to enable the
    lane-dense tiled fast path (tiling an arbitrary func would change
    semantics, so the flag is opt-in and trusted).
    """

    def __init__(self, func, elementwise=False):
        self.func = func
        self.elementwise = elementwise

    def __call__(self, x):
        out_sds = jax.eval_shape(self.func, jax.ShapeDtypeStruct(x.shape, x.dtype))

        if not isinstance(out_sds, jax.ShapeDtypeStruct):
            # func returns a pytree -> plain JAX glue.
            return self.func(x)

        if int(x.size) == 0:
            return self.func(x)

        if self.elementwise and out_sds.shape == x.shape:
            return _elementwise_pallas(self.func, x, out_sds.dtype)

        in_bytes = int(x.size) * jnp.dtype(x.dtype).itemsize
        out_bytes = math.prod(out_sds.shape) * jnp.dtype(out_sds.dtype).itemsize

        if (out_sds.shape == x.shape
                and len(out_sds.shape) >= 1
                and in_bytes + out_bytes <= _WHOLE_ARRAY_BYTE_LIMIT):
            return _whole_array_pallas(self.func, x, out_sds)

        # TODO(synk): shape-changing Lambda funcs (e.g. the tutorial's
        # x.view(batch, -1)) are pure layout glue with no compute; they remain
        # plain JAX rather than an in-kernel relayout.
        return self.func(x)


if __name__ == "__main__":
    key = jax.random.PRNGKey(0)
    k0, k1, k2, k3 = jax.random.split(key, 4)

    lam = Lambda(lambda t: jnp.tanh(t) * 2.0 + 0.5, elementwise=True)

    # ---- 1) Elementwise Lambda on the NCHW demo shape (2, 4, 16, 16) ----
    x = jax.random.normal(k0, (2, 4, 16, 16), dtype=jnp.float32)
    y = jax.block_until_ready(lam(x))
    ref = jnp.tanh(x) * 2.0 + 0.5
    assert y.shape == ref.shape and y.dtype == ref.dtype
    assert jnp.allclose(y, ref, atol=1e-5, rtol=1e-5)

    # ---- 2) Larger elementwise input: multi-step parallel grid (2048 rows -> 2 tiles) ----
    x_big = jax.random.normal(k1, (8, 4, 64, 128), dtype=jnp.float32)
    y_big = jax.block_until_ready(lam(x_big))
    ref_big = jnp.tanh(x_big) * 2.0 + 0.5
    assert jnp.allclose(y_big, ref_big, atol=1e-5, rtol=1e-5)

    # ---- 3) Odd shape: exercises the plain-JAX lane-tail path (no full-array pad) ----
    x_odd = jax.random.normal(k2, (2, 3, 5, 7), dtype=jnp.float32)
    y_odd = jax.block_until_ready(lam(x_odd))
    ref_odd = jnp.tanh(x_odd) * 2.0 + 0.5
    assert y_odd.shape == ref_odd.shape
    assert jnp.allclose(y_odd, ref_odd, atol=1e-5, rtol=1e-5)

    # ---- 4) Rows not divisible by tile_rows: exercises the partial last block ----
    x_part = jax.random.normal(k3, (1544, 128), dtype=jnp.float32)
    y_part = jax.block_until_ready(lam(x_part))
    ref_part = jnp.tanh(x_part) * 2.0 + 0.5
    assert jnp.allclose(y_part, ref_part, atol=1e-5, rtol=1e-5)

    # ---- 5) Generic (non-flagged) shape-preserving func: whole-array block path ----
    lam_generic = Lambda(lambda t: jnp.tanh(t) * 2.0 + 0.5)  # elementwise flag not set
    y_gen = jax.block_until_ready(lam_generic(x))
    assert jnp.allclose(y_gen, ref, atol=1e-5, rtol=1e-5)

    # ---- 6) Tutorial-style reshape Lambda: plain-JAX glue fallback ----
    lam_flat = Lambda(lambda t: t.reshape(t.shape[0], -1))
    flat = jax.block_until_ready(lam_flat(x))
    assert flat.shape == (2, 4 * 16 * 16)
    assert jnp.allclose(flat, x.reshape(2, -1))

    print("KERNEL_OK")
</pallas_src>

<mosaic_0001>
module attributes {stable_mosaic.version = 11 : i64} {
  func.func @_elementwise_kernel(%arg0: i32, %arg1: memref<16x128xf32, #tpu.memory_space<vmem>>, %arg2: memref<16x128xf32, #tpu.memory_space<vmem>>) attributes {dimension_semantics = [#tpu.dimension_semantics<parallel>], iteration_bounds = array<i64: 1>, scalar_prefetch = 0 : i64, scratch_operands = 0 : i64, tpu.core_type = #tpu.core_type<tc>, window_params = [{transform_indices = @transform_0, window_bounds = array<i64: 16, 128>}, {transform_indices = @transform_1, window_bounds = array<i64: 16, 128>}]} {
    %c0 = arith.constant 0 : index
    %c0_0 = arith.constant 0 : index
    %0 = vector.load %arg1[%c0, %c0_0] : memref<16x128xf32, #tpu.memory_space<vmem>>, vector<16x128xf32>
    %1 = math.tanh %0 : vector<16x128xf32>
    %cst = arith.constant 2.000000e+00 : f32
    %2 = vector.broadcast %cst : f32 to vector<16x128xf32>
    %3 = arith.mulf %1, %2 : vector<16x128xf32>
    %cst_1 = arith.constant 5.000000e-01 : f32
    %4 = vector.broadcast %cst_1 : f32 to vector<16x128xf32>
    %5 = arith.addf %3, %4 : vector<16x128xf32>
    %c0_2 = arith.constant 0 : index
    %c0_3 = arith.constant 0 : index
    %6 = vector.load %arg2[%c0_2, %c0_3] : memref<16x128xf32, #tpu.memory_space<vmem>>, vector<16x128xf32>
    tpu.vector_store %arg2[%c0_2, %c0_3], %5 {strides = array<i32>} : memref<16x128xf32, #tpu.memory_space<vmem>>, vector<16x128xf32>,
    return
  }
  func.func @transform_0(%arg0: i32) -> (i32, i32) {
    %c0_i32 = arith.constant 0 : i32
    %c0_i32_0 = arith.constant 0 : i32
    return %arg0, %c0_i32 : i32, i32
  }
  func.func @transform_1(%arg0: i32) -> (i32, i32) {
    %c0_i32 = arith.constant 0 : i32
    %c0_i32_0 = arith.constant 0 : i32
    return %arg0, %c0_i32 : i32, i32
  }
}

</mosaic_0001>

<bundles_post_ra>
// kernel: tpu_custom_call.1
= control target key start
LH: loop header
LB: loop body
LE: loop exit
PB: predicated region body
PF: predicated region fallthrough
CT: control target
= control target key end

     0   :  { %6 = vsyncpa [#allocation3], 0  ;;  %s134_s0 = inlined_call_operand.hbm [shape: f32[16,128], index: 0, kind: input, shape index: {}]   ;;  %s135_s1 = inlined_call_operand.hbm [shape: f32[16,128], index: 1, kind: output, shape index: {}]  }
   0x1   :  { %7 = vsyncpa [#allocation4], 0  ;;  %s12_s8 = sshll.u32 %s134_s0, 4  ;;  %s114_s9 = smov [#allocation2]   ;;  %s13_s8 = int_to_ptr.hbm [resolvable:$true] %s12_s8 }
   0x2   :  { %s14_s10 = sshll.u32 %s114_s9, 4  ;;  %s115_s11 = smov 128   ;;  %s15_s10 = int_to_ptr.vmem [resolvable:$true] %s14_s10 }
   0x3   :  { %s116_s12 = smov 8  }
   0x4   :  { %20 = dma.hbm_to_vmem [thread:$0]  %s13_s8, 256, %s15_s10, [#allocation3], %s115_s11, %s115_s11, %s116_s12  }
   0x5   :  { %110 = dma.done.wait [#allocation3], 256  }
   0x6   :  { %111 = vsyncadd [#allocation3], 4294967040  ;;  %v25_v0 = vld [vmem:[#allocation2] sm:$0xff]  ;;  %v26_v1 = vld [vmem:[#allocation2 + $0x8] sm:$0xff]  ;;  %s117_s13 = smov [#allocation5]   ;;  %s41_s16 = sshll.u32 %s135_s1, 4  ;;  %s42_s16 = int_to_ptr.hbm [resolvable:$true] %s41_s16 }
   0x7   :  { %58 = vtanh.f32 %v25_v0  ;;  %s39_s14 = sshll.u32 %s117_s13, 4  ;;  %s40_s14 = int_to_ptr.vmem [resolvable:$true] %s39_s14 }
   0x8   :  { %60 = vtanh.f32 %v26_v1 }
   0xd   :  { %v59_v2 = vpop.eup %58 }
   0xe   :  { %v61_v3 = vpop.eup %60  ;;  %v29_v4 = vmul.f32 2.0, %v59_v2 }
   0xf   :  { %v30_v5 = vmul.f32 2.0, %v61_v3 }
  0x10   :  { %v31_v6 = vadd.f32 0.5, %v29_v4 }
  0x11   :  { %v32_v7 = vadd.f32 0.5, %v30_v5 }
  0x12   :  { %33 = vst [vmem:[#allocation5] sm:$0xff] %v31_v6 }
  0x13   :  { %34 = vst [vmem:[#allocation5 + $0x8] sm:$0xff] %v32_v7 }
  0x14   :  { %47 = dma.vmem_to_hbm [thread:$0]  %s40_s14, 256, %s42_s16, [#allocation4], %s115_s11, %s115_s11, %s116_s12  }
  0x15   :  { %112 = dma.done.wait [#allocation4], 256  }
  0x16   :  { %113 = vsyncadd [#allocation4], 4294967040 }
  0x17   :  { %52 = vsyncpa [#allocation3], 1 }
  0x18   :  { %53 = vsyncpa [#allocation4], 1 }

</bundles_post_ra>
